<compile_context>
chip_gen: v6e
topology: v6e:2x2x1
jax: 0.10.0
libtpu: 0.0.40
codegen_flags: <defaults>
</compile_context>

<pallas_src>
import math

import jax
import jax.numpy as jnp
from jax import lax
from jax.experimental import pallas as pl
from jax.experimental.pallas import tpu as pltpu


def _clip_loss_kernel(scale_ref, img_ref, txt_ref, out_ref,
                      txt_n_ref, col_max_ref, col_sum_ref,
                      acc_img_ref, acc_diag_ref):
    step = pl.program_id(0)
    n_steps = pl.num_programs(0)
    tm = img_ref.shape[0]
    n = txt_ref.shape[0]

    scale = scale_ref[0]
    # F.normalize clamps the L2 norm at eps=1e-12 -> clamp the squared norm at eps^2.
    eps2 = jnp.float32(1e-24)

    @pl.when(step == 0)
    def _init():
        # Normalize the full text matrix once; keep a bf16 copy as the MXU operand.
        txt = txt_ref[...].astype(jnp.float32)
        inv_t = lax.rsqrt(jnp.maximum(jnp.sum(txt * txt, axis=-1, keepdims=True), eps2))
        txt_n_ref[...] = (txt * inv_t).astype(jnp.bfloat16)
        col_max_ref[...] = jnp.full_like(col_max_ref, -jnp.inf)
        col_sum_ref[...] = jnp.zeros_like(col_sum_ref)
        acc_img_ref[...] = jnp.zeros_like(acc_img_ref)
        acc_diag_ref[...] = jnp.zeros_like(acc_diag_ref)

    # Normalize this image row tile; fold logit_scale into it (saves an N^2 multiply).
    img = img_ref[...].astype(jnp.float32)                                # (TM, D)
    inv_i = lax.rsqrt(jnp.maximum(jnp.sum(img * img, axis=-1, keepdims=True), eps2))
    img_ns = img * (scale * inv_i)                                        # f32, scaled

    # Matching text rows (for the diagonal), normalized in f32 for accuracy.
    row0 = pl.multiple_of(step * tm, tm)
    txt_tile = txt_ref[pl.ds(row0, tm), :].astype(jnp.float32)            # (TM, D)
    inv_tt = lax.rsqrt(jnp.maximum(jnp.sum(txt_tile * txt_tile, axis=-1,
                                           keepdims=True), eps2))
    # diag[i] = logits[g, g], g = step*TM + i (scale already folded into img_ns).
    diag = jnp.sum(img_ns * (txt_tile * inv_tt), axis=-1, keepdims=True)  # (TM, 1)

    # (TM, N) logits slab: bf16 MXU operands, f32 accumulation, contract last dims.
    logits = lax.dot_general(
        img_ns.astype(jnp.bfloat16), txt_n_ref[...],
        dimension_numbers=(((1,), (1,)), ((), ())),
        preferred_element_type=jnp.float32)                               # (TM, N)

    # Image->text cross entropy contribution of this tile (stable row LSE).
    m_row = jnp.max(logits, axis=-1, keepdims=True)                       # (TM, 1)
    lse_row = m_row + jnp.log(jnp.sum(jnp.exp(logits - m_row),
                                      axis=-1, keepdims=True))            # (TM, 1)
    acc_img_ref[...] += jnp.sum(lse_row - diag, axis=0, keepdims=True)    # (1, 1)
    acc_diag_ref[...] += jnp.sum(diag, axis=0, keepdims=True)             # (1, 1)

    # Text->image: online column logsumexp accumulators across row tiles.
    m_blk = jnp.max(logits, axis=0, keepdims=True)                        # (1, N)
    m_new = jnp.maximum(col_max_ref[...], m_blk)
    col_sum_ref[...] = (col_sum_ref[...] * jnp.exp(col_max_ref[...] - m_new)
                        + jnp.sum(jnp.exp(logits - m_new), axis=0, keepdims=True))
    col_max_ref[...] = m_new

    @pl.when(step == n_steps - 1)
    def _finalize():
        lse_col = col_max_ref[...] + jnp.log(col_sum_ref[...])            # (1, N)
        n_f = jnp.float32(n)
        ce_img = acc_img_ref[...] / n_f                                   # (1, 1)
        ce_txt = (jnp.sum(lse_col, axis=-1, keepdims=True) - acc_diag_ref[...]) / n_f
        out_ref[...] = 0.5 * (ce_img + ce_txt)


def clip_loss(image_features, text_features,
              logit_scale=float(math.log(1.0 / 0.07)), *, block_m=128):
    n, d = image_features.shape
    assert text_features.shape == (n, d)

    block_m = min(block_m, n)
    assert n % block_m == 0, "N must be divisible by block_m"
    assert block_m == n or block_m % 8 == 0, "block_m must be a multiple of 8"
    grid = (n // block_m,)

    scale = jnp.asarray([logit_scale], dtype=jnp.float32)
    in_bytes = jnp.dtype(image_features.dtype).itemsize

    # VMEM budget: double-buffered image tile + resident text input + bf16 text
    # scratch + column accumulators + logits-slab temporaries, with margin.
    est = (2 * block_m * d * in_bytes        # double-buffered image tile
           + 2 * n * d * in_bytes            # resident text input (buffered)
           + n * d * 2                       # bf16 normalized text scratch
           + 4 * n * 4                       # column accumulators + temps
           + 3 * block_m * n * 4)            # logits slab + exp temporaries
    vmem_limit = min(int(1.5 * est) + (16 << 20), 64 * 1024 * 1024)

    grid_spec = pltpu.PrefetchScalarGridSpec(
        num_scalar_prefetch=1,
        grid=grid,
        in_specs=[
            pl.BlockSpec((block_m, d), lambda i, s: (i, 0)),   # image row tile
            pl.BlockSpec((n, d), lambda i, s: (0, 0)),         # full text (resident)
        ],
        out_specs=pl.BlockSpec((1, 1), lambda i, s: (0, 0)),
        scratch_shapes=[
            pltpu.VMEM((n, d), jnp.bfloat16),   # normalized text (MXU operand)
            pltpu.VMEM((1, n), jnp.float32),    # running column max
            pltpu.VMEM((1, n), jnp.float32),    # running column exp-sum
            pltpu.VMEM((1, 1), jnp.float32),    # sum_i (lse_row_i - diag_i)
            pltpu.VMEM((1, 1), jnp.float32),    # sum_i diag_i
        ],
    )

    out = pl.pallas_call(
        _clip_loss_kernel,
        out_shape=jax.ShapeDtypeStruct((1, 1), jnp.float32),
        grid_spec=grid_spec,
        compiler_params=pltpu.CompilerParams(
            dimension_semantics=("arbitrary",),   # carried column/row accumulators
            vmem_limit_bytes=vmem_limit,
        ),
        cost_estimate=pl.CostEstimate(
            flops=2 * n * n * d + 8 * n * n + 6 * n * d,
            transcendentals=2 * n * n + 4 * n,
            bytes_accessed=2 * n * d * in_bytes + 4,
        ),
    )(scale, image_features, text_features)
    return out[0, 0]


def _clip_loss_ref(image_features, text_features, logit_scale):
    img = image_features.astype(jnp.float32)
    txt = text_features.astype(jnp.float32)
    img_n = img / jnp.maximum(jnp.linalg.norm(img, axis=-1, keepdims=True), 1e-12)
    txt_n = txt / jnp.maximum(jnp.linalg.norm(txt, axis=-1, keepdims=True), 1e-12)
    logits = logit_scale * img_n @ txt_n.T
    labels = jnp.arange(logits.shape[0])

    def ce(lg):
        lse = jax.scipy.special.logsumexp(lg, axis=-1)
        return jnp.mean(lse - lg[jnp.arange(lg.shape[0]), labels])

    return 0.5 * (ce(logits) + ce(logits.T))


if __name__ == "__main__":
    key = jax.random.PRNGKey(0)
    k1, k2 = jax.random.split(key)
    # Small demo shapes: N=16 rows, D=128 feature dim (lane-aligned), TM=8 -> 2 grid
    # steps so the online column-LSE accumulation path is exercised.
    N, D = 16, 128
    image_features = jax.random.normal(k1, (N, D), dtype=jnp.float32)
    text_features = jax.random.normal(k2, (N, D), dtype=jnp.float32)

    logit_scale = float(math.log(1.0 / 0.07))
    loss = clip_loss(image_features, text_features, logit_scale, block_m=8)
    jax.block_until_ready(loss)

    ref = _clip_loss_ref(image_features, text_features, logit_scale)
    # bf16 MXU operands loosen per-logit precision (~3 decimal digits) -> wider tol.
    assert jnp.allclose(loss, ref, atol=3e-2, rtol=3e-2), (loss, ref)

    print("KERNEL_OK")
</pallas_src>

<mosaic_0001>
module attributes {stable_mosaic.version = 11 : i64} {
  func.func @_clip_loss_kernel(%arg0: i32, %arg1: memref<1xf32, #tpu.memory_space<smem>>, %arg2: memref<8x128xf32, #tpu.memory_space<vmem>>, %arg3: memref<16x128xf32, #tpu.memory_space<vmem>>, %arg4: memref<1x1xf32, #tpu.memory_space<vmem>>, %arg5: memref<16x128xbf16, #tpu.memory_space<vmem>>, %arg6: memref<1x16xf32, #tpu.memory_space<vmem>>, %arg7: memref<1x16xf32, #tpu.memory_space<vmem>>, %arg8: memref<1x1xf32, #tpu.memory_space<vmem>>, %arg9: memref<1x1xf32, #tpu.memory_space<vmem>>) attributes {dimension_semantics = [#tpu.dimension_semantics<arbitrary>], iteration_bounds = array<i64: 2>, scalar_prefetch = 1 : i64, scratch_operands = 5 : i64, tpu.core_type = #tpu.core_type<tc>, window_params = [{transform_indices = @transform_0, window_bounds = array<i64: 8, 128>}, {pipeline_mode = #tpu.pipeline_mode<synchronous>, transform_indices = @transform_1, window_bounds = array<i64: 16, 128>}, {pipeline_mode = #tpu.pipeline_mode<synchronous>, transform_indices = @transform_2, window_bounds = array<i64: 1, 1>}]} {
    %c0 = arith.constant 0 : index
    %0 = memref.load %arg1[%c0] : memref<1xf32, #tpu.memory_space<smem>>
    %c0_i32 = arith.constant 0 : i32
    %1 = arith.cmpi eq, %arg0, %c0_i32 : i32
    %2 = arith.extui %1 : i1 to i32
    %cst = arith.constant 1.000000e-24 : f32
    %c0_i32_0 = arith.constant 0 : i32
    %3 = arith.cmpi ne, %2, %c0_i32_0 : i32
    scf.if %3 {
      %c0_37 = arith.constant 0 : index
      %c0_38 = arith.constant 0 : index
      %73 = vector.load %arg3[%c0_37, %c0_38] : memref<16x128xf32, #tpu.memory_space<vmem>>, vector<16x128xf32>
      %74 = arith.mulf %73, %73 : vector<16x128xf32>
      %cst_39 = arith.constant dense<0.000000e+00> : vector<16xf32>
      %75 = vector.multi_reduction <add>, %74, %cst_39 [1] : vector<16x128xf32> to vector<16xf32>
      %76 = vector.shape_cast %75 : vector<16xf32> to vector<16x1xf32>
      %77 = vector.broadcast %cst : f32 to vector<16x1xf32>
      %78 = arith.maximumf %76, %77 : vector<16x1xf32>
      %79 = math.rsqrt %78 : vector<16x1xf32>
      %80 = vector.broadcast %79 : vector<16x1xf32> to vector<16x128xf32>
      %81 = arith.mulf %73, %80 : vector<16x128xf32>
      %82 = arith.truncf %81 : vector<16x128xf32> to vector<16x128xbf16>
      %c0_40 = arith.constant 0 : index
      %c0_41 = arith.constant 0 : index
      %83 = vector.load %arg5[%c0_40, %c0_41] : memref<16x128xbf16, #tpu.memory_space<vmem>>, vector<16x128xbf16>
      tpu.vector_store %arg5[%c0_40, %c0_41], %82 {strides = array<i32>} : memref<16x128xbf16, #tpu.memory_space<vmem>>, vector<16x128xbf16>,
      %cst_42 = arith.constant 0xFF800000 : f32
      %84 = vector.broadcast %cst_42 : f32 to vector<1x16xf32>
      %c0_43 = arith.constant 0 : index
      %c0_44 = arith.constant 0 : index
      %85 = vector.load %arg6[%c0_43, %c0_44] : memref<1x16xf32, #tpu.memory_space<vmem>>, vector<1x16xf32>
      tpu.vector_store %arg6[%c0_43, %c0_44], %84 {strides = array<i32>} : memref<1x16xf32, #tpu.memory_space<vmem>>, vector<1x16xf32>,
      %cst_45 = arith.constant 0.000000e+00 : f32
      %86 = vector.broadcast %cst_45 : f32 to vector<1x16xf32>
      %c0_46 = arith.constant 0 : index
      %c0_47 = arith.constant 0 : index
      %87 = vector.load %arg7[%c0_46, %c0_47] : memref<1x16xf32, #tpu.memory_space<vmem>>, vector<1x16xf32>
      tpu.vector_store %arg7[%c0_46, %c0_47], %86 {strides = array<i32>} : memref<1x16xf32, #tpu.memory_space<vmem>>, vector<1x16xf32>,
      %cst_48 = arith.constant 0.000000e+00 : f32
      %88 = vector.broadcast %cst_48 : f32 to vector<1x1xf32>
      %c0_49 = arith.constant 0 : index
      %c0_50 = arith.constant 0 : index
      %89 = vector.load %arg8[%c0_49, %c0_50] : memref<1x1xf32, #tpu.memory_space<vmem>>, vector<1x1xf32>
      tpu.vector_store %arg8[%c0_49, %c0_50], %88 {strides = array<i32>} : memref<1x1xf32, #tpu.memory_space<vmem>>, vector<1x1xf32>,
      %cst_51 = arith.constant 0.000000e+00 : f32
      %90 = vector.broadcast %cst_51 : f32 to vector<1x1xf32>
      %c0_52 = arith.constant 0 : index
      %c0_53 = arith.constant 0 : index
      %91 = vector.load %arg9[%c0_52, %c0_53] : memref<1x1xf32, #tpu.memory_space<vmem>>, vector<1x1xf32>
      tpu.vector_store %arg9[%c0_52, %c0_53], %90 {strides = array<i32>} : memref<1x1xf32, #tpu.memory_space<vmem>>, vector<1x1xf32>,
    } else {
    }
    %c0_1 = arith.constant 0 : index
    %c0_2 = arith.constant 0 : index
    %4 = vector.load %arg2[%c0_1, %c0_2] : memref<8x128xf32, #tpu.memory_space<vmem>>, vector<8x128xf32>
    %5 = arith.mulf %4, %4 : vector<8x128xf32>
    %cst_3 = arith.constant dense<0.000000e+00> : vector<8xf32>
    %6 = vector.multi_reduction <add>, %5, %cst_3 [1] : vector<8x128xf32> to vector<8xf32>
    %7 = vector.shape_cast %6 : vector<8xf32> to vector<8x1xf32>
    %cst_4 = arith.constant 1.000000e-24 : f32
    %8 = vector.broadcast %cst_4 : f32 to vector<8x1xf32>
    %9 = arith.maximumf %7, %8 : vector<8x1xf32>
    %10 = math.rsqrt %9 : vector<8x1xf32>
    %11 = vector.broadcast %0 : f32 to vector<8x1xf32>
    %12 = arith.mulf %11, %10 : vector<8x1xf32>
    %13 = vector.broadcast %12 : vector<8x1xf32> to vector<8x128xf32>
    %14 = arith.mulf %4, %13 : vector<8x128xf32>
    %c8_i32 = arith.constant 8 : i32
    %15 = arith.muli %arg0, %c8_i32 : i32
    %16 = tpu.assume_multiple %15, 8 : i32
    %17 = arith.index_cast %16 : i32 to index
    %c0_5 = arith.constant 0 : index
    %18 = vector.load %arg3[%17, %c0_5] : memref<16x128xf32, #tpu.memory_space<vmem>>, vector<8x128xf32>
    %19 = arith.mulf %18, %18 : vector<8x128xf32>
    %cst_6 = arith.constant dense<0.000000e+00> : vector<8xf32>
    %20 = vector.multi_reduction <add>, %19, %cst_6 [1] : vector<8x128xf32> to vector<8xf32>
    %21 = vector.shape_cast %20 : vector<8xf32> to vector<8x1xf32>
    %cst_7 = arith.constant 1.000000e-24 : f32
    %22 = vector.broadcast %cst_7 : f32 to vector<8x1xf32>
    %23 = arith.maximumf %21, %22 : vector<8x1xf32>
    %24 = math.rsqrt %23 : vector<8x1xf32>
    %25 = vector.broadcast %24 : vector<8x1xf32> to vector<8x128xf32>
    %26 = arith.mulf %18, %25 : vector<8x128xf32>
    %27 = arith.mulf %14, %26 : vector<8x128xf32>
    %cst_8 = arith.constant dense<0.000000e+00> : vector<8xf32>
    %28 = vector.multi_reduction <add>, %27, %cst_8 [1] : vector<8x128xf32> to vector<8xf32>
    %29 = vector.shape_cast %28 : vector<8xf32> to vector<8x1xf32>
    %30 = arith.truncf %14 : vector<8x128xf32> to vector<8x128xbf16>
    %c0_9 = arith.constant 0 : index
    %c0_10 = arith.constant 0 : index
    %31 = vector.load %arg5[%c0_9, %c0_10] : memref<16x128xbf16, #tpu.memory_space<vmem>>, vector<16x128xbf16>
    %cst_11 = arith.constant dense<0.000000e+00> : vector<8x16xf32>
    %32 = tpu.matmul %30, %31, %cst_11 {dimension_numbers = #tpu.dot_dimension_numbers<[1], [1], [0], [0], [0, 0, 1, 0], [], []>} : vector<8x128xbf16>, vector<16x128xbf16>, vector<8x16xf32> -> vector<8x16xf32>
    %cst_12 = arith.constant dense<0xFF800000> : vector<8xf32>
    %33 = vector.multi_reduction <maximumf>, %32, %cst_12 [1] : vector<8x16xf32> to vector<8xf32>
    %34 = vector.shape_cast %33 : vector<8xf32> to vector<8x1xf32>
    %35 = vector.broadcast %34 : vector<8x1xf32> to vector<8x16xf32>
    %36 = arith.subf %32, %35 : vector<8x16xf32>
    %37 = math.exp %36 : vector<8x16xf32>
    %cst_13 = arith.constant dense<0.000000e+00> : vector<8xf32>
    %38 = vector.multi_reduction <add>, %37, %cst_13 [1] : vector<8x16xf32> to vector<8xf32>
    %39 = vector.shape_cast %38 : vector<8xf32> to vector<8x1xf32>
    %40 = math.log %39 : vector<8x1xf32>
    %41 = arith.addf %34, %40 : vector<8x1xf32>
    %c0_14 = arith.constant 0 : index
    %c0_15 = arith.constant 0 : index
    %42 = vector.load %arg8[%c0_14, %c0_15] : memref<1x1xf32, #tpu.memory_space<vmem>>, vector<1x1xf32>
    %43 = arith.subf %41, %29 : vector<8x1xf32>
    %cst_16 = arith.constant dense<0.000000e+00> : vector<1xf32>
    %44 = vector.multi_reduction <add>, %43, %cst_16 [0] : vector<8x1xf32> to vector<1xf32>
    %45 = vector.shape_cast %44 : vector<1xf32> to vector<1x1xf32>
    %46 = arith.addf %42, %45 : vector<1x1xf32>
    %c0_17 = arith.constant 0 : index
    %c0_18 = arith.constant 0 : index
    %47 = vector.load %arg8[%c0_17, %c0_18] : memref<1x1xf32, #tpu.memory_space<vmem>>, vector<1x1xf32>
    tpu.vector_store %arg8[%c0_17, %c0_18], %46 {strides = array<i32>} : memref<1x1xf32, #tpu.memory_space<vmem>>, vector<1x1xf32>,
    %c0_19 = arith.constant 0 : index
    %c0_20 = arith.constant 0 : index
    %48 = vector.load %arg9[%c0_19, %c0_20] : memref<1x1xf32, #tpu.memory_space<vmem>>, vector<1x1xf32>
    %cst_21 = arith.constant dense<0.000000e+00> : vector<1xf32>
    %49 = vector.multi_reduction <add>, %29, %cst_21 [0] : vector<8x1xf32> to vector<1xf32>
    %50 = vector.shape_cast %49 : vector<1xf32> to vector<1x1xf32>
    %51 = arith.addf %48, %50 : vector<1x1xf32>
    %c0_22 = arith.constant 0 : index
    %c0_23 = arith.constant 0 : index
    %52 = vector.load %arg9[%c0_22, %c0_23] : memref<1x1xf32, #tpu.memory_space<vmem>>, vector<1x1xf32>
    tpu.vector_store %arg9[%c0_22, %c0_23], %51 {strides = array<i32>} : memref<1x1xf32, #tpu.memory_space<vmem>>, vector<1x1xf32>,
    %cst_24 = arith.constant dense<0xFF800000> : vector<16xf32>
    %53 = vector.multi_reduction <maximumf>, %32, %cst_24 [0] : vector<8x16xf32> to vector<16xf32>
    %54 = vector.shape_cast %53 : vector<16xf32> to vector<1x16xf32>
    %c0_25 = arith.constant 0 : index
    %c0_26 = arith.constant 0 : index
    %55 = vector.load %arg6[%c0_25, %c0_26] : memref<1x16xf32, #tpu.memory_space<vmem>>, vector<1x16xf32>
    %56 = arith.maximumf %55, %54 : vector<1x16xf32>
    %c0_27 = arith.constant 0 : index
    %c0_28 = arith.constant 0 : index
    %57 = vector.load %arg7[%c0_27, %c0_28] : memref<1x16xf32, #tpu.memory_space<vmem>>, vector<1x16xf32>
    %c0_29 = arith.constant 0 : index
    %c0_30 = arith.constant 0 : index
    %58 = vector.load %arg6[%c0_29, %c0_30] : memref<1x16xf32, #tpu.memory_space<vmem>>, vector<1x16xf32>
    %59 = arith.subf %58, %56 : vector<1x16xf32>
    %60 = math.exp %59 : vector<1x16xf32>
    %61 = arith.mulf %57, %60 : vector<1x16xf32>
    %62 = vector.broadcast %56 : vector<1x16xf32> to vector<8x16xf32>
    %63 = arith.subf %32, %62 : vector<8x16xf32>
    %64 = math.exp %63 : vector<8x16xf32>
    %cst_31 = arith.constant dense<0.000000e+00> : vector<16xf32>
    %65 = vector.multi_reduction <add>, %64, %cst_31 [0] : vector<8x16xf32> to vector<16xf32>
    %66 = vector.shape_cast %65 : vector<16xf32> to vector<1x16xf32>
    %67 = arith.addf %61, %66 : vector<1x16xf32>
    %c0_32 = arith.constant 0 : index
    %c0_33 = arith.constant 0 : index
    %68 = vector.load %arg7[%c0_32, %c0_33] : memref<1x16xf32, #tpu.memory_space<vmem>>, vector<1x16xf32>
    tpu.vector_store %arg7[%c0_32, %c0_33], %67 {strides = array<i32>} : memref<1x16xf32, #tpu.memory_space<vmem>>, vector<1x16xf32>,
    %c0_34 = arith.constant 0 : index
    %c0_35 = arith.constant 0 : index
    %69 = vector.load %arg6[%c0_34, %c0_35] : memref<1x16xf32, #tpu.memory_space<vmem>>, vector<1x16xf32>
    tpu.vector_store %arg6[%c0_34, %c0_35], %56 {strides = array<i32>} : memref<1x16xf32, #tpu.memory_space<vmem>>, vector<1x16xf32>,
    %c1_i32 = arith.constant 1 : i32
    %70 = arith.cmpi eq, %arg0, %c1_i32 : i32
    %71 = arith.extui %70 : i1 to i32
    %c0_i32_36 = arith.constant 0 : i32
    %72 = arith.cmpi ne, %71, %c0_i32_36 : i32
    scf.if %72 {
      %c0_37 = arith.constant 0 : index
      %c0_38 = arith.constant 0 : index
      %73 = vector.load %arg6[%c0_37, %c0_38] : memref<1x16xf32, #tpu.memory_space<vmem>>, vector<1x16xf32>
      %c0_39 = arith.constant 0 : index
      %c0_40 = arith.constant 0 : index
      %74 = vector.load %arg7[%c0_39, %c0_40] : memref<1x16xf32, #tpu.memory_space<vmem>>, vector<1x16xf32>
      %75 = math.log %74 : vector<1x16xf32>
      %76 = arith.addf %73, %75 : vector<1x16xf32>
      %c0_41 = arith.constant 0 : index
      %c0_42 = arith.constant 0 : index
      %77 = vector.load %arg8[%c0_41, %c0_42] : memref<1x1xf32, #tpu.memory_space<vmem>>, vector<1x1xf32>
      %cst_43 = arith.constant 1.600000e+01 : f32
      %78 = vector.broadcast %cst_43 : f32 to vector<1x1xf32>
      %79 = arith.divf %77, %78 : vector<1x1xf32>
      %cst_44 = arith.constant dense<0.000000e+00> : vector<1xf32>
      %80 = vector.multi_reduction <add>, %76, %cst_44 [1] : vector<1x16xf32> to vector<1xf32>
      %81 = vector.shape_cast %80 : vector<1xf32> to vector<1x1xf32>
      %c0_45 = arith.constant 0 : index
      %c0_46 = arith.constant 0 : index
      %82 = vector.load %arg9[%c0_45, %c0_46] : memref<1x1xf32, #tpu.memory_space<vmem>>, vector<1x1xf32>
      %83 = arith.subf %81, %82 : vector<1x1xf32>
      %cst_47 = arith.constant 1.600000e+01 : f32
      %84 = vector.broadcast %cst_47 : f32 to vector<1x1xf32>
      %85 = arith.divf %83, %84 : vector<1x1xf32>
      %86 = arith.addf %79, %85 : vector<1x1xf32>
      %cst_48 = arith.constant 5.000000e-01 : f32
      %87 = vector.broadcast %cst_48 : f32 to vector<1x1xf32>
      %88 = arith.mulf %87, %86 : vector<1x1xf32>
      %c0_49 = arith.constant 0 : index
      %c0_50 = arith.constant 0 : index
      %89 = vector.load %arg4[%c0_49, %c0_50] : memref<1x1xf32, #tpu.memory_space<vmem>>, vector<1x1xf32>
      tpu.vector_store %arg4[%c0_49, %c0_50], %88 {strides = array<i32>} : memref<1x1xf32, #tpu.memory_space<vmem>>, vector<1x1xf32>,
    } else {
    }
    return
  }
  func.func @transform_0(%arg0: i32, %arg1: memref<1xf32, #tpu.memory_space<smem>>) -> (i32, i32) {
    %c0_i32 = arith.constant 0 : i32
    %c0_i32_0 = arith.constant 0 : i32
    return %arg0, %c0_i32 : i32, i32
  }
  func.func @transform_1(%arg0: i32, %arg1: memref<1xf32, #tpu.memory_space<smem>>) -> (i32, i32) {
    %c0_i32 = arith.constant 0 : i32
    %c0_i32_0 = arith.constant 0 : i32
    %c0_i32_1 = arith.constant 0 : i32
    return %c0_i32, %c0_i32_0 : i32, i32
  }
  func.func @transform_2(%arg0: i32, %arg1: memref<1xf32, #tpu.memory_space<smem>>) -> (i32, i32) {
    %c0_i32 = arith.constant 0 : i32
    %c0_i32_0 = arith.constant 0 : i32
    %c0_i32_1 = arith.constant 0 : i32
    return %c0_i32, %c0_i32_0 : i32, i32
  }
}

</mosaic_0001>

<bundles_post_ra>
// kernel: tpu_custom_call.1
= control target key start
LH: loop header
LB: loop body
LE: loop exit
PB: predicated region body
PF: predicated region fallthrough
CT: control target
= control target key end

     0   :  { %s842_s0 = inlined_call_operand.<no memory space> [shape: f32[1], index: 0, kind: input, shape index: {}]   ;;  %s843_s1 = inlined_call_operand.hbm [shape: f32[16,128], index: 1, kind: input, shape index: {}]   ;;  %s844_s2 = inlined_call_operand.hbm [shape: f32[16,128], index: 2, kind: input, shape index: {}]   ;;  %s845_s3 = inlined_call_operand.hbm [shape: f32[1,1], index: 3, kind: output, shape index: {}]  }
   0x1   :  { %8 = sst [smem:[#allocation8]] %s842_s0 }
   0x2   :  { %9 = vsyncpa [#allocation10], 0 }
   0x3   :  { %11 = vsyncpa [#allocation10 + $0x1], 0 }
   0x4   :  { %12 = vsyncpa [#allocation13], 0 }
   0x5   :  { %13 = vsyncpa [#allocation11], 0  ;;  %s696_s14 = smov 0   ;;  %s698_s15 = smov 0  }
   0x6   :  { %s700_s16 = smov 0   ;;  %s702_s17 = smov 0  }
   0x7 LB: > { %s715_s0 = sadd.s32 4294967295, %s662_s17   ;;  %p39_p0 = scmp.ne.s32.totalorder %s654_s15, %s650_s14  ;;  %s662_s17 = sphi %s702_s17, %s861_s17   ;;  %s658_s16 = sphi %s700_s16, %s860_s16   ;;  %s654_s15 = sphi %s698_s15, %s859_s15   ;;  %s650_s14 = sphi %s696_s14, %s858_s14  }
   0x8   : > { %p846_p1 = scmp.eq.s32.totalorder %s715_s0, 0  ;;  %p427_p2 = scmp.ge.s32.totalorder %s662_s17, 1 }
   0x9   : > { %p92_p3 = scmp.lt.s32.totalorder %s662_s17, 3  ;;  %s664_s20 = smov [#allocation12]  }
   0xa   : > { %p724_p5 = por %p846_p1, %p39_p0  ;;  %s104_s21 = sshll.u32 %s664_s20, 4  ;;  %s105_s21 = int_to_ptr.vmem [resolvable:$true] %s104_s21 }
   0xb   : > { %p728_p6 = pnand %p427_p2, %p92_p3  ;;  %s741_s23 = sadd.s32 1, %s662_s17  }
   0xc   : > { %s849_s18 = scalar_select %p724_p5, 1, 0 }
   0xd   : > { %s850_s19 = scalar_select %p728_p6, 1, 0 }
   0xe   : > { %p470_p7 = pneg %p728_p6  ;;  %s26_s24 = sadd.s32 1, %s658_s16 }
   0xf   : > { %s23_s25 = ssub.s32 %s662_s17, %s741_s23  ;;  %s553_s26 = scalar_lea.vmem %s105_s21, 256 }
  0x10   : > { %p736_p8 = pnand %p470_p7, %p846_p1  ;;  %p554_p10 = scmp.ne.s32.totalorder %s105_s21, %s553_s26 }
  0x11   : > { %p561_p13 = scmp.lt.s32.totalorder %s105_s21, %s105_s21  ;;  %p562_p0 = scmp.lt.s32.totalorder %s553_s26, %s553_s26 }
  0x12   : > { %p544_p9 = pneg %p736_p8 }
  0x13   : > { %p563_p2 = por %p562_p0, %p561_p13 }
  0x14   : > { %p556_p11 = pnand %p554_p10, %p544_p9 }
  0x16   : > { %p557_p12 = pneg %p556_p11 }
  0x18   : > { %p564_p3 = pnand %p563_p2, %p557_p12 }
  0x1a   : > { %567 = shalt.err (!%p564_p3)
}
  0x1b   : > { %s665_s27 = smov 128   ;;  %s666_s28 = smov 8  }
  0x1c   : > { %473 = dma.hbm_to_vmem [thread:$0]  (!%p736_p8), %s844_s2, 256, %s105_s21, [#allocation13], %s665_s27, %s665_s27, %s666_s28  }
  0x1d   : > { %p24_p7 = scmp.eq.s32.totalorder %s23_s25, 0  ;;  %p33_p9 = scmp.ne.s32.totalorder %s658_s16, %s654_s15 }
  0x1e   : > { %p34_p10 = scmp.eq.s32.totalorder %s662_s17, 0  ;;  %p479_p11 = scmp.lt.s32.totalorder %s662_s17, 2 }
  0x1f   : > { %s758_s4 = scalar_select %p24_p7, %s658_s16, %s26_s24  }
  0x20   : > { %p35_p12 = por %p34_p10, %p33_p9  ;;  %s118_s5 = sand.u32 1, %s658_s16  }
  0x21   : > { %s430_s6 = sshll.u32 %s118_s5, 3  ;;  %s431_s7 = sshll.u32 %s662_s17, 7 }
  0x22   : > { %s765_s10 = scalar_lea.hbm %s843_s1, %s431_s7  ;;  %s122_s11 = scalar_lea.vmem [#allocation9], %s430_s6 }
  0x23   : > { %s129_s12 = sshll.u32 %s122_s11, 4  ;;  %p767_p8 = pnand %p479_p11, %p35_p12  ;;  %s130_s12 = int_to_ptr.vmem [resolvable:$true] %s129_s12 }
  0x24   : > { %s119_s14 = scalar_lea.sflag [#allocation10], %s118_s5  ;;  %s568_s20 = scalar_lea.hbm %s765_s10, 128 }
  0x25   : > { %p569_p13 = scmp.ne.s32.totalorder %s765_s10, %s568_s20  ;;  %p570_p0 = pneg %p767_p8 }
  0x26   : > { %s573_s22 = scalar_lea.hbm %s843_s1, 256  ;;  %p574_p7 = scmp.lt.s32.totalorder %s765_s10, %s843_s1 }
  0x27   : > { %p571_p2 = pnand %p570_p0, %p569_p13  ;;  %p575_p9 = scmp.lt.s32.totalorder %s573_s22, %s568_s20 }
  0x29   : > { %p572_p3 = pneg %p571_p2  ;;  %p576_p10 = por %p575_p9, %p574_p7 }
  0x2b   : > { %p577_p11 = pnand %p576_p10, %p572_p3 }
  0x2d   : > { %580 = shalt.err (!%p577_p11)
}
  0x2e   : > { %s581_s26 = scalar_lea.vmem %s130_s12, 128  ;;  %s667_s27 = smov [#allocation9]  }
  0x2f   : > { %p582_p12 = scmp.ne.s32.totalorder %s130_s12, %s581_s26  ;;  %s586_s28 = sshll.u32 %s667_s27, 4  ;;  %s587_s28 = int_to_ptr.vmem [resolvable:$false] %s586_s28 }
  0x30   : > { %s588_s29 = scalar_lea.vmem %s587_s28, 256  ;;  %p589_p13 = scmp.lt.s32.totalorder %s130_s12, %s587_s28 }
  0x31   : > { %p584_p4 = pnand %p582_p12, %p570_p0  ;;  %p590_p2 = scmp.lt.s32.totalorder %s588_s29, %s581_s26 }
  0x33   : > { %p585_p1 = pneg %p584_p4  ;;  %p591_p5 = por %p590_p2, %p589_p13 }
  0x35   : > { %p592_p6 = pnand %p591_p5, %p585_p1 }
  0x37   : > { %595 = shalt.err (!%p592_p6)
}
  0x38   : > { %477 = dma.hbm_to_vmem [thread:$0]  (!%p767_p8), %s765_s10, 128, %s130_s12, %s119_s14  }
  0x39   : > { %p853_p3 = scmp.ne.s32.totalorder %s850_s19, 0 }
  0x3a   : > { %s140_s30 = sand.u32 (!%p853_p3), 1, %s654_s15   ;;  %p854_p4 = scmp.ne.s32.totalorder (!%p853_p3), %s849_s18, 0 }
  0x3b   : > { %138 = sbr.rel (%p853_p3) target bundleno = 1110 (0x456), region = 28  ;;  %s788_s5 = sshll.u32 (!%p853_p3), %s140_s30, 3 }
  0x3c   : > { %s141_s6 = scalar_lea.sflag (!%p853_p3), [#allocation10], %s140_s30  ;;  %s144_s7 = scalar_lea.vmem (!%p853_p3), [#allocation9], %s788_s5 }
  0x40   : > { %637 = dma.done.wait (%p854_p4), %s141_s6, 128  }
  0x41   : > { %639 = vsyncadd (%p854_p4), %s141_s6, 4294967168  ;;  %p855_p1 = scmp.eq.s32.totalorder %s715_s0, 0 }
  0x43   : > { %641 = dma.done.wait (%p855_p1), [#allocation13], 256   ;;  %p856_p5 = pmov %p855_p1 }
  0x44   : > { %s799_s19 = sld [smem:[#allocation8]]  ;;  %p857_p6 = scmp.ne.s32.totalorder %s715_s0, 0 }
  0x45   : > { %643 = vsyncadd (%p856_p5), [#allocation13], 4294967040 }
  0x46   : > { %169 = sbr.rel (%p857_p6) target bundleno = 241 (0xf1), region = 40 }
  0x4b   : > { %v170_v0 = vld [vmem:[#allocation12] sm:$0xff]  ;;  %v171_v1 = vld [vmem:[#allocation12 + $0x8] sm:$0xff]  ;;  %vm194_vm0 = vcmask 122880   ;;  %vm197_vm1 = vcmask 0   ;;  %v668_v4 = vmov -inf   ;;  %v669_v5 = vmov 0.0  }
  0x4c   : > { %v172_v2 = vmul.f32 %v170_v0, %v170_v0  ;;  %v173_v3 = vmul.f32 %v171_v1, %v171_v1  ;;  %195 = vst.msk [vmem:[#allocation3] sm:$0x1] %vm194_vm0, %v668_v4  ;;  %196 = vst.msk [vmem:[#allocation4] sm:$0x1] %vm194_vm0, %v669_v5 }
  0x4d   : > { %198 = vst.msk [vmem:[#allocation5] sm:$0x1] %vm197_vm1, %v669_v5  ;;  %199 = vst.msk [vmem:[#allocation6] sm:$0x1] %vm197_vm1, %v669_v5 }
  0x4e   : > { %174 = vadd.xlane.f32.xlu0 %v172_v2 }
  0x52   : > { %176 = vadd.xlane.f32.xlu0 %v173_v3 }
  0xd7   : > { %v175_v6 = vpop.xlane.xlu0 %174 }
  0xd8   : > { %v178_v7 = vmax.f32 %v175_v6, 1e-24 }
  0xda   : > { %523 = vrsqrt.f32 %v178_v7 }
  0xdb   : > { %v177_v8 = vpop.xlane.xlu0 %176 }
  0xdc   : > { %v179_v9 = vmax.f32 %v177_v8, 1e-24 }
  0xde   : > { %525 = vrsqrt.f32 %v179_v9 }
  0xe7   : > { %v524_v10 = vpop.eup %523 }
  0xe8   : > { %v182_v12 = vmul.f32 %v524_v10, %v170_v0 }
  0xeb   : > { %v526_v11 = vpop.eup %525 }
  0xec   : > { %v183_v13 = vmul.f32 %v526_v11, %v171_v1 }
  0xee   : > { %v450_v14 = vpack.c.bf16 %v183_v13, %v182_v12 }
  0xf0   : > { %451 = vst [vmem:[#allocation2] sm:$0xff] %v450_v14  }
  0xf1 PF: > { %v200_v15 = vld [vmem:[%s144_s7] sm:$0xff]  ;;  %s438_s18 = sshll.u32 %s715_s0, 3  ;;  %v670_v20 = vmov 0.0   ;;  %vm671_vm2 = vmmov 0   ;;  %v206_v23 = vstv %s799_s19  ;;  %vm270_vm3 = vcmask 130048   ;;  %p440_p8 = scmp.ne.s32.totalorder %s715_s0, 1 }
  0xf2   : > { %v201_v16 = vmul.f32 %v200_v15, %v200_v15  ;;  %s210_s8 = scalar_lea.vmem [#allocation12], %s438_s18  ;;  %454 = vmatprep.subr.bf16.mxu0 %v670_v20  ;;  %456 = vmatprep.mubr.msk.bf16.mxu0 %vm671_vm2, %v670_v20  ;;  %v317_v36 = vlaneseq  ;;  %v309_v45 = vld [vmem:[#allocation3] sm:$0x1]  ;;  %vm333_vm4 = vcmask 122880   ;;  %v311_v61 = vld [vmem:[#allocation4] sm:$0x1] }
  0xf3   : > { %v211_v17 = vld [vmem:[%s210_s8] sm:$0xff]  ;;  %v294_v11 = vld [vmem:[#allocation6] sm:$0x1]  ;;  %vm292_vm5 = vcmask 0  }
  0xf4   : > { %202 = vadd.xlane.f32.xlu0 %v201_v16  ;;  %v212_v18 = vmul.f32 %v211_v17, %v211_v17  ;;  %v318_v42 = vshrl.u32 %v317_v36, 7 }
  0xf6   : > { %213 = vadd.xlane.f32.xlu1 %v212_v18  ;;  %v319_v46 = vsub.s32 0, %v318_v42 }
  0xf7   : > { %v527_v19 = vld [vmem:[#allocation2] sm:$0xff]  }
  0xf8   : > { %455 = vmatpush3.bf16.xpose.msra.mxu0 %v527_v19 }
 0x17d   : > { %v203_v21 = vpop.xlane.xlu0 %202 }
 0x17e   : > { %v204_v22 = vmax.f32 %v203_v21, 1e-24 }
 0x17f   : > { %v214_v28 = vpop.xlane.xlu1 %213 }
 0x180   : > { %528 = vrsqrt.f32 %v204_v22  ;;  %v215_v29 = vmax.f32 %v214_v28, 1e-24 }
 0x182   : > { %530 = vrsqrt.f32 %v215_v29 }
 0x18d   : > { %v529_v24 = vpop.eup %528 }
 0x18e   : > { %v207_v25 = vmul.f32 %v529_v24, %v206_v23 }
 0x18f   : > { %v531_v30 = vpop.eup %530 }
 0x190   : > { %v208_v26 = vmul.f32 %v207_v25, %v200_v15  ;;  %v217_v32 = vmul.f32 %v531_v30, %v211_v17 }
 0x192   : > { %v221_v27 = vpack.c.bf16 %v208_v26, %v208_v26  ;;  %v218_v39 = vmul.f32 %v217_v32, %v208_v26  ;;  %v283_v26 = vld [vmem:[#allocation5] sm:$0x1] }
 0x194   : > { %457 = vmatmul.mubr.bf16.vlgmr.msra.gmra.mxu0 %v221_v27 }
 0x254   : > { %v264_v31 = vpop.f32.mrf.mxu0 }
 0x255   : > { %v271_v33 = vsel %vm270_vm3, %v264_v31, -inf }
 0x256   : > { %272 = vmax.xlane.f32.xlu0 %v271_v33  ;;  %v303_v34 = vrot.slane %v271_v33, 4  ;;  %v458_v35 = vpop.f32.mrf.mxu0 }
 0x258   : > { %v304_v37 = vmax.f32 %v271_v33, %v303_v34  ;;  %v267_v38 = vpop.f32.mrf.mxu0 }
 0x25a   : > { %v305_v40 = vrot.slane %v304_v37, 2  ;;  %v459_v41 = vpop.f32.mrf.mxu0  ;;  %219 = vadd.xlane.f32.xlu0 %v218_v39 }
 0x25c   : > { %v306_v43 = vmax.f32 %v304_v37, %v305_v40 }
 0x25e   : > { %v307_v44 = vrot.slane %v306_v43, 1 }
 0x260   : > { %v308_v47 = vmax.f32 %v306_v43, %v307_v44 }
 0x262   : > { %v310_v48 = vmax.f32 %v309_v45, %v308_v47 }
 0x264   : > { %v320_v49 = vrot.slane %v310_v48, %v319_v46  ;;  %335 = vst.msk [vmem:[#allocation3] sm:$0x1] %vm333_vm4, %v310_v48  ;;  %v312_v52 = vsub.f32 %v309_v45, %v310_v48 }
 0x266   : > { %v322_v50 = vsub.f32 %v264_v31, %v320_v49  ;;  %v313_v53 = vmul.f32 1.442695, %v312_v52 }
 0x268   : > { %v323_v51 = vmul.f32 1.442695, %v322_v50 }
 0x26a   : > { %532 = vpow2.f32 %v323_v51 }
 0x26b   : > { %534 = vpow2.f32 %v313_v53 }
 0x277   : > { %v533_v54 = vpop.eup %532 }
 0x278   : > { %v325_v55 = vsel %vm270_vm3, %v533_v54, 0.0  ;;  %v535_v60 = vpop.eup %534 }
 0x279   : > { %v326_v56 = vrot.slane %v325_v55, 4  ;;  %v315_v63 = vmul.f32 %v535_v60, %v311_v61 }
 0x27b   : > { %v327_v57 = vadd.f32 %v326_v56, %v325_v55 }
 0x27d   : > { %v328_v58 = vrot.slane %v327_v57, 2 }
 0x27f   : > { %v329_v59 = vadd.f32 %v328_v58, %v327_v57 }
 0x281   : > { %v330_v62 = vrot.slane %v329_v59, 1 }
 0x283   : > { %v331_v0 = vadd.f32 %v330_v62, %v329_v59 }
 0x285   : > { %v332_v1 = vadd.f32 %v331_v0, %v315_v63 }
 0x287   : > { %334 = vst.msk [vmem:[#allocation4] sm:$0x1] %vm333_vm4, %v332_v1 }
 0x2df   : > { %v273_v2 = vpop.xlane.xlu0 %272 }
 0x2e0   : > { %v274_v3 = vsub.f32 %v264_v31, %v273_v2 }
 0x2e2   : > { %v275_v4 = vmul.f32 1.442695, %v274_v3 }
 0x2e3   : > { %v220_v5 = vpop.xlane.xlu0 %219 }
 0x2e4   : > { %536 = vpow2.f32 %v275_v4  ;;  %v295_v6 = vrot.slane %v220_v5, 4 }
 0x2e6   : > { %v296_v7 = vadd.f32 %v295_v6, %v220_v5 }
 0x2e8   : > { %v297_v8 = vrot.slane %v296_v7, 2 }
 0x2ea   : > { %v298_v9 = vadd.f32 %v297_v8, %v296_v7 }
 0x2ec   : > { %v299_v10 = vrot.slane %v298_v9, 1 }
 0x2ee   : > { %v300_v12 = vadd.f32 %v299_v10, %v298_v9 }
 0x2f0   : > { %v301_v13 = vadd.f32 %v300_v12, %v294_v11 }
 0x2f1   : > { %v537_v14 = vpop.eup %536 }
 0x2f2   : > { %302 = vst.msk [vmem:[#allocation6] sm:$0x1] %vm292_vm5, %v301_v13  ;;  %v277_v15 = vsel %vm270_vm3, %v537_v14, 0.0 }
 0x2f3   : > { %278 = vadd.xlane.f32.xlu1 %v277_v15 }
 0x37c   : > { %v279_v16 = vpop.xlane.xlu1 %278 }
 0x37d   : > { %538 = vlog2.f32 %v279_v16 }
 0x38a   : > { %v539_v17 = vpop.eup %538 }
 0x38b   : > { %v281_v18 = vmul.f32 0.6931472, %v539_v17 }
 0x38d   : > { %v282_v19 = vadd.f32 %v281_v18, %v273_v2 }
 0x38f   : > { %v284_v20 = vsub.f32 %v282_v19, %v220_v5 }
 0x391   : > { %v285_v21 = vrot.slane %v284_v20, 4 }
 0x393   : > { %v286_v22 = vadd.f32 %v285_v21, %v284_v20 }
 0x395   : > { %v287_v23 = vrot.slane %v286_v22, 2 }
 0x397   : > { %v288_v24 = vadd.f32 %v287_v23, %v286_v22 }
 0x399   : > { %v289_v25 = vrot.slane %v288_v24, 1 }
 0x39b   : > { %v290_v27 = vadd.f32 %v289_v25, %v288_v24  ;;  %339 = sbr.rel (%p440_p8) target bundleno = 1095 (0x447), region = 44 }
 0x39d   : > { %v291_v28 = vadd.f32 %v290_v27, %v283_v26 }
 0x39f   : > { %293 = vst.msk [vmem:[#allocation5] sm:$0x1] %vm292_vm5, %v291_v28 }
 0x3a0   : > { %v341_v29 = vld [vmem:[#allocation4] sm:$0x1]  ;;  %v340_v31 = vld [vmem:[#allocation3] sm:$0x1]  ;;  %v351_v36 = vld [vmem:[#allocation6] sm:$0x1] }
 0x3a1   : > { %540 = vlog2.f32 %v341_v29 }
 0x3a6   : > { %v345_v35 = vld [vmem:[#allocation5] sm:$0x1] }
 0x3a7   : > { %v347_v38 = vmul.f32 0.0625, %v345_v35 }
 0x3ae   : > { %v541_v30 = vpop.eup %540 }
 0x3af   : > { %v343_v32 = vmul.f32 0.6931472, %v541_v30 }
 0x3b1   : > { %v344_v33 = vadd.f32 %v343_v32, %v340_v31 }
 0x3b3   : > { %v348_v34 = vsel %vm333_vm4, %v344_v33, 0.0 }
 0x3b4   : > { %349 = vadd.xlane.f32.xlu0 %v348_v34 }
 0x43d   : > { %v350_v37 = vpop.xlane.xlu0 %349 }
 0x43e   : > { %v352_v39 = vsub.f32 %v350_v37, %v351_v36 }
 0x440   : > { %v353_v40 = vmul.f32 0.0625, %v352_v39 }
 0x442   : > { %v354_v41 = vadd.f32 %v353_v40, %v347_v38 }
 0x444   : > { %v355_v42 = vmul.f32 0.5, %v354_v41 }
 0x446   : > { %356 = vst.msk [vmem:[#allocation14] sm:$0x1] %vm292_vm5, %v355_v42 }
 0x447 PF: > { %p481_p0 = scmp.eq.s32.totalorder %s715_s0, 1  ;;  %s672_s9 = smov [#allocation14]  }
 0x448   : > { %s364_s10 = sshll.u32 %s672_s9, 4  ;;  %s365_s10 = int_to_ptr.vmem [resolvable:$true] %s364_s10 }
 0x449   : > { %s596_s11 = scalar_lea.vmem %s365_s10, 16  ;;  %s602_s12 = scalar_lea.vmem %s365_s10, 32 }
 0x44a   : > { %p597_p7 = scmp.ne.s32.totalorder %s365_s10, %s596_s11  ;;  %p603_p11 = scmp.lt.s32.totalorder %s365_s10, %s365_s10 }
 0x44b   : > { %p604_p12 = scmp.lt.s32.totalorder %s602_s12, %s596_s11 }
 0x44c   : > { %p598_p9 = pnand %p597_p7, %p481_p0 }
 0x44d   : > { %p605_p13 = por %p604_p12, %p603_p11 }
 0x44e   : > { %p599_p10 = pneg %p598_p9 }
 0x450   : > { %p606_p2 = pnand %p605_p13, %p599_p10 }
 0x452   : > { %609 = shalt.err (!%p606_p2)
}
 0x453   : > { %467 = dma.vmem_to_hbm [thread:$0]  (%p481_p0), %s365_s10, 16, %s845_s3, [#allocation11]  }
 0x454   : > { %645 = dma.done.wait (%p481_p0), [#allocation11], 16  }
 0x455   : > { %647 = vsyncadd (%p481_p0), [#allocation11], 4294967280 }
 0x456 PF: > { %p16_p3 = scmp.ge.s32.totalorder %s741_s23, 4   ;;  %s858_s14 = smov %s654_s15 }
 0x457   : > { %s859_s15 = smov %s658_s16  ;;  %s860_s16 = smov %s758_s4 }
 0x458   : > { %s861_s17 = smov %s741_s23  ;;  %18 = sbr.rel (!%p16_p3) target bundleno = 7 (0x7), region = 78 }
 0x45d   :  { %377 = vsyncpa [#allocation10], 1 }
 0x45e   :  { %379 = vsyncpa [#allocation10 + $0x1], 1 }
 0x45f   :  { %380 = vsyncpa [#allocation13], 1 }
 0x460   :  { %381 = vsyncpa [#allocation11], 1 }
 0x461   :  { %383 = vsyncpa [#allocation11 + $0x1], 1 }

</bundles_post_ra>
